<compile_context>
chip_gen: v7x
topology: tpu7x:2x2x1
jax: 0.10.0
libtpu: 0.0.40
codegen_flags: <defaults>
</compile_context>

<pallas_src>
import functools

import jax
import jax.numpy as jnp
from jax.experimental import pallas as pl
from jax.experimental.pallas import tpu as pltpu

THRESH = 0.5
EPS = 1e-16

LANES = 128
SUBLANES = 8
ROW_ALIGN = 32           # lcm of sublane packing for f32 (8), bf16 (16), int8 (32)
MAX_BLOCK_ROWS = 8192    # (8192, 128) f32 = 4 MiB per input block


def _tensorcores_per_device() -> int:
    """Best-effort TensorCores behind one JAX device (2 on v7x / v4 megacore)."""
    try:
        kind = jax.devices()[0].device_kind.lower()
    except Exception:
        return 1
    if "7" in kind or "v4" in kind:
        return 2
    return 1   # v5e / v6e (and anything unknown): single TensorCore


def _reduce_kernel(pred_ref, lbl_ref, out_ref, *, lebna1, lebna2):
    """Accumulates 5 block statistics into a resident (5, 8, 128) output.

    out_ref[0] : sum over mask_p of log(p + eps) * label
    out_ref[1] : count(mask_p)
    out_ref[2] : sum over mask_n of log(1 - p + eps) * (1 - label)
    out_ref[3] : count(mask_n)
    out_ref[4] : count(label >= 0.5)
    """
    @pl.when(pl.program_id(1) == 0)
    def _():
        out_ref[...] = jnp.zeros_like(out_ref)

    p = pred_ref[...].astype(jnp.float32)
    l = lbl_ref[...].astype(jnp.float32)

    gt = p > THRESH
    mask_p = gt & (p <= lebna2)                     # positive side
    mask_n = jnp.logical_not(gt) & (p >= lebna1)    # negative side

    # The f32 casts double as the count statistics AND as the weights that
    # squash contributions of unselected / padded elements (no extra selects).
    m_p = mask_p.astype(jnp.float32)
    m_n = mask_n.astype(jnp.float32)
    m_lpos = (l >= THRESH).astype(jnp.float32)

    # Single transcendental per element; single select on its argument.  When
    # neither mask holds, arg = 1 - p which stays positive for sigmoid-style
    # predictions in [0, 1] and for the zero padding (arg = 1), so no NaN can
    # leak through the m_* products below.
    arg = jnp.where(mask_p, p, 1.0 - p)
    lg = jnp.log(arg + EPS)

    term_p = lg * (m_p * l)
    term_n = lg * (m_n * (1.0 - l))

    k = p.shape[0] // SUBLANES

    def red(x):
        # Leading-axis reduction -> pure VPU vreg adds (no XLU sublane reduce
        # in the hot loop): (block_rows, 128) -> (8, 128).
        return jnp.sum(x.reshape(k, SUBLANES, LANES), axis=0)

    out_ref[0] += red(term_p)
    out_ref[1] += red(m_p)
    out_ref[2] += red(term_n)
    out_ref[3] += red(m_n)
    out_ref[4] += red(m_lpos)


def new_weighted_entropy_loss(pred, label, lebna1=0.1, lebna2=0.9, alpha=2.5,
                              *, max_block_rows=MAX_BLOCK_ROWS, num_cores=None):
    """Forward of new_weighted_entropy (ch=1 / else branch).

    NOTE: the zero-padding trick assumes lebna1 > 0 (default 0.1) so padded
    elements fall outside mask_n; pred is assumed to be a probability in [0,1].
    """
    # TODO(synk): ch==2 branch (2-channel softmax form) not implemented; default ch=1 path only.
    N = label.shape[0]                       # matches torch: N = label.size()[0]

    pf = jnp.asarray(pred).reshape(-1)
    lf = jnp.asarray(label).reshape(-1)
    # Stream inputs in their native dtype (bf16 / int8) and cast to f32 inside
    # the kernel; bool has no clean VMEM tiling, so ship it as int8.
    if pf.dtype == jnp.bool_:
        pf = pf.astype(jnp.int8)
    if lf.dtype == jnp.bool_:
        lf = lf.astype(jnp.int8)

    total = pf.shape[0]
    if total == 0:
        # torch.mean over empty selections yields NaN; mirror that.
        return jnp.float32(float("nan"))

    rows = -(-total // LANES)                                 # ceil(total / 128)
    block_rows = min(int(max_block_rows), rows)
    block_rows = -(-block_rows // ROW_ALIGN) * ROW_ALIGN      # multiple of 32
    num_blocks = -(-rows // block_rows)
    ncores = num_cores if num_cores is not None else _tensorcores_per_device()
    ncores = max(1, min(int(ncores), num_blocks))
    bpc = -(-num_blocks // ncores)                            # blocks per core

    # Pad up to a whole grid of blocks.  Zero padding falls outside every mask
    # (0 !> 0.5, 0 < lebna1, 0 !>= 0.5), so no in-kernel validity mask or index
    # clamp is needed and padded elements contribute exactly nothing.
    padded_rows = ncores * bpc * block_rows
    padded = padded_rows * LANES
    if padded != total:
        pf = jnp.pad(pf, (0, padded - total))
        lf = jnp.pad(lf, (0, padded - total))
    pf = pf.reshape(padded_rows, LANES)
    lf = lf.reshape(padded_rows, LANES)

    # Double-buffered input blocks + tiny outputs + headroom.  Raises v5e's
    # 16 MiB scoped default and stays under v7x's 64 MiB physical VMEM.
    in_block_bytes = block_rows * LANES * (pf.dtype.itemsize + lf.dtype.itemsize)
    vmem_limit = max(32 * 1024 * 1024, 2 * in_block_bytes + (4 << 20))

    kernel = functools.partial(_reduce_kernel,
                               lebna1=float(lebna1), lebna2=float(lebna2))

    def in_map(c, b):
        return (c * bpc + b, 0)

    out = pl.pallas_call(
        kernel,
        out_shape=jax.ShapeDtypeStruct((ncores * 5, SUBLANES, LANES), jnp.float32),
        grid_spec=pltpu.PrefetchScalarGridSpec(
            num_scalar_prefetch=0,
            grid=(ncores, bpc),
            in_specs=[
                pl.BlockSpec((block_rows, LANES), in_map),
                pl.BlockSpec((block_rows, LANES), in_map),
            ],
            out_specs=pl.BlockSpec((5, SUBLANES, LANES), lambda c, b: (c, 0, 0)),
        ),
        compiler_params=pltpu.CompilerParams(
            # On dual-TensorCore chips the leading "parallel" axis shards the
            # reduction across cores; it is a no-op on v5e/v6e (ncores == 1).
            # TODO(synk): on v7x confirm with xprof that both TCs engage; if
            # not, switch axis 0 to pltpu.CORE_PARALLEL / pl.core_map.
            dimension_semantics=("parallel", "arbitrary"),
            vmem_limit_bytes=int(vmem_limit)),
    )(pf, lf)

    # Tiny scalar epilogue in plain JAX.
    sums = out.reshape(ncores, 5, SUBLANES, LANES).sum(axis=(0, 2, 3))   # (5,)
    sum_p, cnt_p, sum_n, cnt_n, cnt_lpos = sums

    beta = cnt_lpos / N
    # NOTE: cnt_p / cnt_n == 0 yields NaN/Inf, exactly like torch.mean over an
    # empty selection in the reference module.
    p_r_mean = -beta * (sum_p / cnt_p)
    n_r_mean = -alpha * (1.0 - beta) * (sum_n / cnt_n)
    return p_r_mean + n_r_mean


def _reference_jax(pred, label, lebna1=0.1, lebna2=0.9, alpha=2.5):
    """Pure-JAX mirror of the PyTorch else-branch forward, for validation."""
    N = label.shape[0]
    p = jnp.asarray(pred).reshape(-1).astype(jnp.float32)
    l = jnp.asarray(label).reshape(-1).astype(jnp.float32)
    mask_p = (p > THRESH) & (p <= lebna2)
    mask_n = (p <= THRESH) & (p >= lebna1)
    beta = jnp.sum((l >= THRESH).astype(jnp.float32)) / N
    term_p = jnp.where(mask_p, jnp.log(jnp.where(mask_p, p, 0.5) + EPS) * l, 0.0)
    term_n = jnp.where(mask_n, jnp.log(1.0 - jnp.where(mask_n, p, 0.5) + EPS) * (1.0 - l), 0.0)
    p_r = -beta * (jnp.sum(term_p) / jnp.sum(mask_p))
    n_r = -alpha * (1.0 - beta) * (jnp.sum(term_n) / jnp.sum(mask_n))
    return p_r + n_r


if __name__ == "__main__":
    key = jax.random.PRNGKey(0)
    kp, kl, kp2, kl2, kp3, kl3 = jax.random.split(key, 6)

    # 1) Small f32 case (NCHW, sigmoid-style pred, binary label).
    pred = jax.random.uniform(kp, (2, 1, 16, 16), dtype=jnp.float32)
    label = (jax.random.uniform(kl, (2, 1, 16, 16)) > 0.5).astype(jnp.float32)
    loss = jax.block_until_ready(new_weighted_entropy_loss(pred, label))
    ref = jax.block_until_ready(_reference_jax(pred, label))
    assert jnp.allclose(loss, ref, rtol=1e-4, atol=1e-5), (loss, ref)

    # 2) Larger case streamed in native bf16 (exercises the ragged lane tail,
    #    zero padding and the half-HBM-traffic dtype path; both sides see the
    #    same bf16-rounded values).
    pred2 = jax.random.uniform(kp2, (2, 3, 300, 300), dtype=jnp.float32).astype(jnp.bfloat16)
    label2 = (jax.random.uniform(kl2, (2, 3, 300, 300)) > 0.5).astype(jnp.bfloat16)
    loss2 = jax.block_until_ready(new_weighted_entropy_loss(pred2, label2))
    ref2 = jax.block_until_ready(_reference_jax(pred2, label2))
    assert jnp.allclose(loss2, ref2, rtol=1e-4, atol=1e-5), (loss2, ref2)

    # 3) Bool label (shipped to the kernel as int8) with f32 pred.
    pred3 = jax.random.uniform(kp3, (2, 1, 32, 32), dtype=jnp.float32)
    label3 = jax.random.uniform(kl3, (2, 1, 32, 32)) > 0.5
    loss3 = jax.block_until_ready(new_weighted_entropy_loss(pred3, label3))
    ref3 = jax.block_until_ready(_reference_jax(pred3, label3))
    assert jnp.allclose(loss3, ref3, rtol=1e-4, atol=1e-5), (loss3, ref3)

    # 4) Same data as (2) but with small blocks and a forced 2-way core split:
    #    exercises multi-step accumulation across the "arbitrary" axis, the
    #    whole-block zero padding and the per-core output slabs.
    loss4 = jax.block_until_ready(
        new_weighted_entropy_loss(pred2, label2, max_block_rows=512, num_cores=2))
    assert jnp.allclose(loss4, ref2, rtol=1e-4, atol=1e-5), (loss4, ref2)

    print("KERNEL_OK")
</pallas_src>

<mosaic_0001>
module attributes {stable_mosaic.version = 11 : i64} {
  func.func @_reduce_kernel(%arg0: i32, %arg1: i32, %arg2: memref<32x128xf32, #tpu.memory_space<vmem>>, %arg3: memref<32x128xf32, #tpu.memory_space<vmem>>, %arg4: memref<5x8x128xf32, #tpu.memory_space<vmem>>) attributes {dimension_semantics = [#tpu.dimension_semantics<parallel>, #tpu.dimension_semantics<arbitrary>], iteration_bounds = array<i64: 1, 1>, scalar_prefetch = 0 : i64, scratch_operands = 0 : i64, tpu.core_type = #tpu.core_type<tc>, window_params = [{transform_indices = @transform_0, window_bounds = array<i64: 32, 128>}, {transform_indices = @transform_1, window_bounds = array<i64: 32, 128>}, {transform_indices = @transform_2, window_bounds = array<i64: 5, 8, 128>}]} {
    %c0_i32 = arith.constant 0 : i32
    %0 = arith.cmpi eq, %arg1, %c0_i32 : i32
    %1 = arith.extui %0 : i1 to i32
    %c0_i32_0 = arith.constant 0 : i32
    %2 = arith.cmpi ne, %1, %c0_i32_0 : i32
    scf.if %2 {
      %cst_42 = arith.constant 0.000000e+00 : f32
      %74 = vector.broadcast %cst_42 : f32 to vector<5x8x128xf32>
      %c0_43 = arith.constant 0 : index
      %c0_44 = arith.constant 0 : index
      %c0_45 = arith.constant 0 : index
      %75 = vector.load %arg4[%c0_43, %c0_44, %c0_45] : memref<5x8x128xf32, #tpu.memory_space<vmem>>, vector<5x8x128xf32>
      tpu.vector_store %arg4[%c0_43, %c0_44, %c0_45], %74 {strides = array<i32>} : memref<5x8x128xf32, #tpu.memory_space<vmem>>, vector<5x8x128xf32>,
    } else {
    }
    %c0 = arith.constant 0 : index
    %c0_1 = arith.constant 0 : index
    %3 = vector.load %arg2[%c0, %c0_1] : memref<32x128xf32, #tpu.memory_space<vmem>>, vector<32x128xf32>
    %c0_2 = arith.constant 0 : index
    %c0_3 = arith.constant 0 : index
    %4 = vector.load %arg3[%c0_2, %c0_3] : memref<32x128xf32, #tpu.memory_space<vmem>>, vector<32x128xf32>
    %cst = arith.constant 5.000000e-01 : f32
    %5 = vector.broadcast %cst : f32 to vector<32x128xf32>
    %6 = arith.cmpf ogt, %3, %5 : vector<32x128xf32>
    %cst_4 = arith.constant 0.899999976 : f32
    %7 = vector.broadcast %cst_4 : f32 to vector<32x128xf32>
    %8 = arith.cmpf ole, %3, %7 : vector<32x128xf32>
    %9 = arith.andi %6, %8 : vector<32x128xi1>
    %cst_5 = arith.constant dense<true> : vector<32x128xi1>
    %10 = arith.xori %6, %cst_5 : vector<32x128xi1>
    %cst_6 = arith.constant 1.000000e-01 : f32
    %11 = vector.broadcast %cst_6 : f32 to vector<32x128xf32>
    %12 = arith.cmpf oge, %3, %11 : vector<32x128xf32>
    %13 = arith.andi %10, %12 : vector<32x128xi1>
    %14 = arith.extui %9 : vector<32x128xi1> to vector<32x128xi32>
    %15 = arith.sitofp %14 : vector<32x128xi32> to vector<32x128xf32>
    %16 = arith.extui %13 : vector<32x128xi1> to vector<32x128xi32>
    %17 = arith.sitofp %16 : vector<32x128xi32> to vector<32x128xf32>
    %cst_7 = arith.constant 5.000000e-01 : f32
    %18 = vector.broadcast %cst_7 : f32 to vector<32x128xf32>
    %19 = arith.cmpf oge, %4, %18 : vector<32x128xf32>
    %20 = arith.extui %19 : vector<32x128xi1> to vector<32x128xi32>
    %21 = arith.sitofp %20 : vector<32x128xi32> to vector<32x128xf32>
    %cst_8 = arith.constant 1.000000e+00 : f32
    %22 = vector.broadcast %cst_8 : f32 to vector<32x128xf32>
    %23 = arith.subf %22, %3 : vector<32x128xf32>
    %24 = arith.select %9, %3, %23 : vector<32x128xi1>, vector<32x128xf32>
    %cst_9 = arith.constant 1.000000e-16 : f32
    %25 = vector.broadcast %cst_9 : f32 to vector<32x128xf32>
    %26 = arith.addf %24, %25 : vector<32x128xf32>
    %27 = math.log %26 : vector<32x128xf32>
    %28 = arith.mulf %15, %4 : vector<32x128xf32>
    %29 = arith.mulf %27, %28 : vector<32x128xf32>
    %cst_10 = arith.constant 1.000000e+00 : f32
    %30 = vector.broadcast %cst_10 : f32 to vector<32x128xf32>
    %31 = arith.subf %30, %4 : vector<32x128xf32>
    %32 = arith.mulf %17, %31 : vector<32x128xf32>
    %33 = arith.mulf %27, %32 : vector<32x128xf32>
    %c0_11 = arith.constant 0 : index
    %c0_12 = arith.constant 0 : index
    %c0_13 = arith.constant 0 : index
    %34 = vector.load %arg4[%c0_11, %c0_12, %c0_13] : memref<5x8x128xf32, #tpu.memory_space<vmem>>, vector<1x8x128xf32>
    %35 = vector.shape_cast %34 : vector<1x8x128xf32> to vector<8x128xf32>
    %36 = vector.shape_cast %29 : vector<32x128xf32> to vector<4x8x128xf32>
    %cst_14 = arith.constant dense<0.000000e+00> : vector<8x128xf32>
    %37 = vector.multi_reduction <add>, %36, %cst_14 [0] : vector<4x8x128xf32> to vector<8x128xf32>
    %38 = arith.addf %35, %37 : vector<8x128xf32>
    %c0_15 = arith.constant 0 : index
    %c0_16 = arith.constant 0 : index
    %c0_17 = arith.constant 0 : index
    %39 = vector.load %arg4[%c0_15, %c0_16, %c0_17] : memref<5x8x128xf32, #tpu.memory_space<vmem>>, vector<1x8x128xf32>
    %40 = vector.shape_cast %39 : vector<1x8x128xf32> to vector<8x128xf32>
    %41 = vector.shape_cast %38 : vector<8x128xf32> to vector<1x8x128xf32>
    tpu.vector_store %arg4[%c0_15, %c0_16, %c0_17], %41 {strides = array<i32>} : memref<5x8x128xf32, #tpu.memory_space<vmem>>, vector<1x8x128xf32>,
    %c1 = arith.constant 1 : index
    %c0_18 = arith.constant 0 : index
    %c0_19 = arith.constant 0 : index
    %42 = vector.load %arg4[%c1, %c0_18, %c0_19] : memref<5x8x128xf32, #tpu.memory_space<vmem>>, vector<1x8x128xf32>
    %43 = vector.shape_cast %42 : vector<1x8x128xf32> to vector<8x128xf32>
    %44 = vector.shape_cast %15 : vector<32x128xf32> to vector<4x8x128xf32>
    %cst_20 = arith.constant dense<0.000000e+00> : vector<8x128xf32>
    %45 = vector.multi_reduction <add>, %44, %cst_20 [0] : vector<4x8x128xf32> to vector<8x128xf32>
    %46 = arith.addf %43, %45 : vector<8x128xf32>
    %c1_21 = arith.constant 1 : index
    %c0_22 = arith.constant 0 : index
    %c0_23 = arith.constant 0 : index
    %47 = vector.load %arg4[%c1_21, %c0_22, %c0_23] : memref<5x8x128xf32, #tpu.memory_space<vmem>>, vector<1x8x128xf32>
    %48 = vector.shape_cast %47 : vector<1x8x128xf32> to vector<8x128xf32>
    %49 = vector.shape_cast %46 : vector<8x128xf32> to vector<1x8x128xf32>
    tpu.vector_store %arg4[%c1_21, %c0_22, %c0_23], %49 {strides = array<i32>} : memref<5x8x128xf32, #tpu.memory_space<vmem>>, vector<1x8x128xf32>,
    %c2 = arith.constant 2 : index
    %c0_24 = arith.constant 0 : index
    %c0_25 = arith.constant 0 : index
    %50 = vector.load %arg4[%c2, %c0_24, %c0_25] : memref<5x8x128xf32, #tpu.memory_space<vmem>>, vector<1x8x128xf32>
    %51 = vector.shape_cast %50 : vector<1x8x128xf32> to vector<8x128xf32>
    %52 = vector.shape_cast %33 : vector<32x128xf32> to vector<4x8x128xf32>
    %cst_26 = arith.constant dense<0.000000e+00> : vector<8x128xf32>
    %53 = vector.multi_reduction <add>, %52, %cst_26 [0] : vector<4x8x128xf32> to vector<8x128xf32>
    %54 = arith.addf %51, %53 : vector<8x128xf32>
    %c2_27 = arith.constant 2 : index
    %c0_28 = arith.constant 0 : index
    %c0_29 = arith.constant 0 : index
    %55 = vector.load %arg4[%c2_27, %c0_28, %c0_29] : memref<5x8x128xf32, #tpu.memory_space<vmem>>, vector<1x8x128xf32>
    %56 = vector.shape_cast %55 : vector<1x8x128xf32> to vector<8x128xf32>
    %57 = vector.shape_cast %54 : vector<8x128xf32> to vector<1x8x128xf32>
    tpu.vector_store %arg4[%c2_27, %c0_28, %c0_29], %57 {strides = array<i32>} : memref<5x8x128xf32, #tpu.memory_space<vmem>>, vector<1x8x128xf32>,
    %c3 = arith.constant 3 : index
    %c0_30 = arith.constant 0 : index
    %c0_31 = arith.constant 0 : index
    %58 = vector.load %arg4[%c3, %c0_30, %c0_31] : memref<5x8x128xf32, #tpu.memory_space<vmem>>, vector<1x8x128xf32>
    %59 = vector.shape_cast %58 : vector<1x8x128xf32> to vector<8x128xf32>
    %60 = vector.shape_cast %17 : vector<32x128xf32> to vector<4x8x128xf32>
    %cst_32 = arith.constant dense<0.000000e+00> : vector<8x128xf32>
    %61 = vector.multi_reduction <add>, %60, %cst_32 [0] : vector<4x8x128xf32> to vector<8x128xf32>
    %62 = arith.addf %59, %61 : vector<8x128xf32>
    %c3_33 = arith.constant 3 : index
    %c0_34 = arith.constant 0 : index
    %c0_35 = arith.constant 0 : index
    %63 = vector.load %arg4[%c3_33, %c0_34, %c0_35] : memref<5x8x128xf32, #tpu.memory_space<vmem>>, vector<1x8x128xf32>
    %64 = vector.shape_cast %63 : vector<1x8x128xf32> to vector<8x128xf32>
    %65 = vector.shape_cast %62 : vector<8x128xf32> to vector<1x8x128xf32>
    tpu.vector_store %arg4[%c3_33, %c0_34, %c0_35], %65 {strides = array<i32>} : memref<5x8x128xf32, #tpu.memory_space<vmem>>, vector<1x8x128xf32>,
    %c4 = arith.constant 4 : index
    %c0_36 = arith.constant 0 : index
    %c0_37 = arith.constant 0 : index
    %66 = vector.load %arg4[%c4, %c0_36, %c0_37] : memref<5x8x128xf32, #tpu.memory_space<vmem>>, vector<1x8x128xf32>
    %67 = vector.shape_cast %66 : vector<1x8x128xf32> to vector<8x128xf32>
    %68 = vector.shape_cast %21 : vector<32x128xf32> to vector<4x8x128xf32>
    %cst_38 = arith.constant dense<0.000000e+00> : vector<8x128xf32>
    %69 = vector.multi_reduction <add>, %68, %cst_38 [0] : vector<4x8x128xf32> to vector<8x128xf32>
    %70 = arith.addf %67, %69 : vector<8x128xf32>
    %c4_39 = arith.constant 4 : index
    %c0_40 = arith.constant 0 : index
    %c0_41 = arith.constant 0 : index
    %71 = vector.load %arg4[%c4_39, %c0_40, %c0_41] : memref<5x8x128xf32, #tpu.memory_space<vmem>>, vector<1x8x128xf32>
    %72 = vector.shape_cast %71 : vector<1x8x128xf32> to vector<8x128xf32>
    %73 = vector.shape_cast %70 : vector<8x128xf32> to vector<1x8x128xf32>
    tpu.vector_store %arg4[%c4_39, %c0_40, %c0_41], %73 {strides = array<i32>} : memref<5x8x128xf32, #tpu.memory_space<vmem>>, vector<1x8x128xf32>,
    return
  }
  func.func @transform_0(%arg0: i32, %arg1: i32) -> (i32, i32) {
    %c1_i32 = arith.constant 1 : i32
    %0 = arith.muli %arg0, %c1_i32 : i32
    %1 = arith.addi %0, %arg1 : i32
    %c0_i32 = arith.constant 0 : i32
    %c0_i32_0 = arith.constant 0 : i32
    return %1, %c0_i32 : i32, i32
  }
  func.func @transform_1(%arg0: i32, %arg1: i32) -> (i32, i32) {
    %c1_i32 = arith.constant 1 : i32
    %0 = arith.muli %arg0, %c1_i32 : i32
    %1 = arith.addi %0, %arg1 : i32
    %c0_i32 = arith.constant 0 : i32
    %c0_i32_0 = arith.constant 0 : i32
    return %1, %c0_i32 : i32, i32
  }
  func.func @transform_2(%arg0: i32, %arg1: i32) -> (i32, i32, i32) {
    %c0_i32 = arith.constant 0 : i32
    %c0_i32_0 = arith.constant 0 : i32
    %c0_i32_1 = arith.constant 0 : i32
    return %arg0, %c0_i32, %c0_i32_0 : i32, i32, i32
  }
}

</mosaic_0001>

<bundles_post_ra>
// kernel: tpu_custom_call.1
= control target key start
LH: loop header
LB: loop body
LE: loop exit
PB: predicated region body
PF: predicated region fallthrough
CT: control target
= control target key end

     0   :  { %7 = vsyncpa [#allocation3], 0  ;;  %s446_s0 = inlined_call_operand.hbm [shape: f32[32,128], index: 0, kind: input, shape index: {}]   ;;  %s447_s1 = inlined_call_operand.hbm [shape: f32[32,128], index: 1, kind: input, shape index: {}]   ;;  %s448_s2 = inlined_call_operand.hbm [shape: f32[5,8,128], index: 2, kind: output, shape index: {}]  }
   0x1   :  { %8 = vsyncpa [#allocation6], 0 }
   0x2   :  { %9 = vsyncpa [#allocation4], 0  ;;  %s312_s9 = smov [#allocation2]   ;;  %s240_s13 = scalar_lea.hbm %s446_s0, 512 }
   0x3   :  { %s19_s10 = sshll.u32 %s312_s9, 4  ;;  %p241_p0 = scmp.ne.s32.totalorder %s446_s0, %s240_s13  ;;  %s20_s10 = int_to_ptr.vmem [resolvable:$true] %s19_s10 }
   0x4   :  { %p244_p1 = scmp.lt.u32.totalorder %s240_s13, %s446_s0 }
   0x6   :  { %p246_p2 = pnand %p244_p1, %p241_p0 }
   0x8   :  { %249 = shalt.err (!%p246_p2)
}
   0x9   :  { %s250_s18 = scalar_lea.vmem %s20_s10, 512  ;;  %p255_p4 = scmp.lt.s32.totalorder %s20_s10, %s20_s10 }
   0xa   :  { %p251_p3 = scmp.ne.s32.totalorder %s20_s10, %s250_s18  ;;  %p256_p5 = scmp.lt.s32.totalorder %s250_s18, %s250_s18 }
   0xc   :  { %p257_p6 = por %p256_p5, %p255_p4 }
   0xe   :  { %p258_p7 = pnand %p257_p6, %p251_p3 }
  0x10   :  { %261 = shalt.err (!%p258_p7)
}
  0x11   :  { %s313_s19 = smov 128   ;;  %s314_s20 = smov 8  }
  0x12   :  { %25 = dma.hbm_to_vmem [thread:$0]  %s446_s0, 512, %s20_s10, [#allocation3], %s313_s19, %s313_s19, %s314_s20  }
  0x13   :  { %s315_s23 = smov [#allocation5]   ;;  %s262_s27 = scalar_lea.hbm %s447_s1, 512 }
  0x14   :  { %s35_s24 = sshll.u32 %s315_s23, 4  ;;  %p263_p8 = scmp.ne.s32.totalorder %s447_s1, %s262_s27  ;;  %s36_s24 = int_to_ptr.vmem [resolvable:$true] %s35_s24 }
  0x15   :  { %p266_p9 = scmp.lt.u32.totalorder %s262_s27, %s447_s1 }
  0x17   :  { %p268_p10 = pnand %p266_p9, %p263_p8 }
  0x19   :  { %271 = shalt.err (!%p268_p10)
}
  0x1a   :  { %s272_s4 = scalar_lea.vmem %s36_s24, 512  ;;  %p277_p12 = scmp.lt.s32.totalorder %s36_s24, %s36_s24 }
  0x1b   :  { %p273_p11 = scmp.ne.s32.totalorder %s36_s24, %s272_s4  ;;  %p278_p13 = scmp.lt.s32.totalorder %s272_s4, %s272_s4 }
  0x1d   :  { %p279_p0 = por %p278_p13, %p277_p12 }
  0x1f   :  { %p280_p1 = pnand %p279_p0, %p273_p11 }
  0x21   :  { %283 = shalt.err (!%p280_p1)
}
  0x22   :  { %41 = dma.hbm_to_vmem [thread:$0]  %s447_s1, 512, %s36_s24, [#allocation6], %s313_s19, %s313_s19, %s314_s20  }
  0x23   :  { %306 = dma.done.wait [#allocation3], 512  }
  0x24   :  { %307 = vsyncadd [#allocation3], 4294966784 }
  0x25   :  { %308 = dma.done.wait [#allocation6], 512  }
  0x26   :  { %309 = vsyncadd [#allocation6], 4294966784  ;;  %v61_v0 = vld [vmem:[#allocation2] sm:$0xff]  ;;  %v62_v1 = vld [vmem:[#allocation2 + $0x8] sm:$0xff]  ;;  %vm316_vm5 = vmmov 1   ;;  %v317_v21 = vmov 0.0  }
  0x27   :  { %v63_v2 = vld [vmem:[#allocation2 + $0x10] sm:$0xff]  ;;  %v64_v3 = vld [vmem:[#allocation2 + $0x18] sm:$0xff]  ;;  %vm69_vm0 = vcmp.gt.f32.partialorder %v61_v0, 0.5  ;;  %vm70_vm1 = vcmp.gt.f32.partialorder %v62_v1, 0.5  ;;  %vm73_vm4 = vcmp.le.f32.partialorder %v61_v0, 0.9 }
  0x28   :  { %vm71_vm2 = vcmp.gt.f32.partialorder %v63_v2, 0.5  ;;  %vm72_vm3 = vcmp.gt.f32.partialorder %v64_v3, 0.5  ;;  %v121_v4 = vsub.f32 1.0, %v61_v0  ;;  %vm365_vm6 = vmxor %vm69_vm0, %vm316_vm5  ;;  %vm74_vm7 = vcmp.le.f32.partialorder %v62_v1, 0.9  ;;  %v65_v26 = vld [vmem:[#allocation5] sm:$0xff] }
  0x29   :  { %vm75_vm8 = vcmp.le.f32.partialorder %v63_v2, 0.9  ;;  %vm76_vm9 = vcmp.le.f32.partialorder %v64_v3, 0.9  ;;  %vm369_vm10 = vmand %vm69_vm0, %vm73_vm4  ;;  %v122_v8 = vsub.f32 1.0, %v62_v1  ;;  %v123_v9 = vsub.f32 1.0, %v63_v2 }
  0x2a   :  { %vm374_vm11 = vmand %vm70_vm1, %vm74_vm7  ;;  %v124_v10 = vsub.f32 1.0, %v64_v3  ;;  %v125_v12 = vsel %vm369_vm10, %v61_v0, %v121_v4  ;;  %vm85_vm15 = vcmp.ge.f32.partialorder %v61_v0, 0.1  ;;  %v213_v22 = vsel %vm369_vm10, 1.0, %v317_v21  ;;  %v66_v27 = vld [vmem:[#allocation5 + $0x8] sm:$0xff]  ;;  %v67_v30 = vld [vmem:[#allocation5 + $0x10] sm:$0xff] }
  0x2b   :  { %vm379_vm12 = vmand %vm71_vm2, %vm75_vm8  ;;  %v126_v14 = vsel %vm374_vm11, %v62_v1, %v122_v8  ;;  %v129_v16 = vadd.f32 1e-16, %v125_v12  ;;  %v214_v23 = vsel %vm374_vm11, 1.0, %v317_v21  ;;  %vm86_vm4 = vcmp.ge.f32.partialorder %v62_v1, 0.1  ;;  %v68_v32 = vld [vmem:[#allocation5 + $0x18] sm:$0xff] }
  0x2c   :  { %vm386_vm13 = vmand %vm72_vm3, %vm76_vm9  ;;  %v127_v15 = vsel %vm379_vm12, %v63_v2, %v123_v9  ;;  %v130_v18 = vadd.f32 1e-16, %v126_v14  ;;  %v169_v28 = vadd.f32 %v214_v23, %v213_v22  ;;  %v215_v31 = vsel %vm379_vm12, 1.0, %v317_v21  ;;  %s318_s1 = smov [#allocation7]  }
  0x2d   :  { %v128_v17 = vsel %vm386_vm13, %v64_v3, %v124_v10  ;;  %v131_v19 = vadd.f32 1e-16, %v127_v15  ;;  %vm398_vm14 = vmxor %vm70_vm1, %vm316_vm5  ;;  %232 = vlog2.f32 %v129_v16  ;;  %vm88_vm7 = vcmp.ge.f32.partialorder %v64_v3, 0.1  ;;  %s200_s6 = sshll.u32 %s318_s1, 4  ;;  %s201_s6 = int_to_ptr.vmem [resolvable:$true] %s200_s6 }
  0x2e   :  { %v132_v24 = vadd.f32 1e-16, %v128_v17  ;;  %vm408_vm0 = vmxor %vm71_vm2, %vm316_vm5  ;;  %234 = vlog2.f32 %v130_v18  ;;  %vm87_vm2 = vcmp.ge.f32.partialorder %v63_v2, 0.1  ;;  %v170_v33 = vadd.f32 %v215_v31, %v169_v28  ;;  %s284_s7 = scalar_lea.vmem %s201_s6, 640  ;;  %p289_p3 = scmp.lt.s32.totalorder %s201_s6, %s201_s6 }
  0x2f   :  { %vm414_vm1 = vmxor %vm72_vm3, %vm316_vm5  ;;  %236 = vlog2.f32 %v131_v19  ;;  %v216_v34 = vsel %vm386_vm13, 1.0, %v317_v21  ;;  %v149_v37 = vsub.f32 1.0, %v65_v26  ;;  %v150_v39 = vsub.f32 1.0, %v66_v27  ;;  %p285_p2 = scmp.ne.s32.totalorder %s201_s6, %s284_s7  ;;  %p290_p4 = scmp.lt.s32.totalorder %s284_s7, %s284_s7 }
  0x30   :  { %vm89_vm8 = vmand %vm365_vm6, %vm85_vm15  ;;  %238 = vlog2.f32 %v132_v24  ;;  %v171_v38 = vadd.f32 %v216_v34, %v170_v33  ;;  %v151_v40 = vsub.f32 1.0, %v67_v30  ;;  %v152_v43 = vsub.f32 1.0, %v68_v32 }
  0x31   :  { %vm90_vm3 = vmand %vm398_vm14, %vm86_vm4  ;;  %v217_v35 = vsel %vm89_vm8, 1.0, %v317_v21  ;;  %vm109_vm6 = vcmp.ge.f32.partialorder %v65_v26, 0.5  ;;  %vm110_vm10 = vcmp.ge.f32.partialorder %v66_v27, 0.5  ;;  %vm111_vm11 = vcmp.ge.f32.partialorder %v67_v30, 0.5  ;;  %p291_p5 = por %p290_p4, %p289_p3 }
  0x32   :  { %vm91_vm5 = vmand %vm408_vm0, %vm87_vm2  ;;  %v218_v36 = vsel %vm90_vm3, 1.0, %v317_v21  ;;  %vm112_vm12 = vcmp.ge.f32.partialorder %v68_v32, 0.5  ;;  %v221_v46 = vsel %vm109_vm6, 1.0, %v317_v21  ;;  %v222_v47 = vsel %vm110_vm10, 1.0, %v317_v21  ;;  %173 = vst [vmem:[#allocation7 + $0x8] sm:$0xff] %v171_v38 }
  0x33   :  { %vm92_vm9 = vmand %vm414_vm1, %vm88_vm7  ;;  %v183_v41 = vadd.f32 %v218_v36, %v217_v35  ;;  %v219_v42 = vsel %vm91_vm5, 1.0, %v317_v21  ;;  %v223_v48 = vsel %vm111_vm11, 1.0, %v317_v21  ;;  %v141_v49 = vmul.f32 %v213_v22, %v65_v26  ;;  %p292_p6 = pnand %p291_p5, %p285_p2 }
  0x34   :  { %v220_v44 = vsel %vm92_vm9, 1.0, %v317_v21  ;;  %v153_v50 = vmul.f32 %v217_v35, %v149_v37  ;;  %v190_v52 = vadd.f32 %v222_v47, %v221_v46  ;;  %v142_v54 = vmul.f32 %v214_v23, %v66_v27 }
  0x35   :  { %v184_v45 = vadd.f32 %v219_v42, %v183_v41  ;;  %v143_v55 = vmul.f32 %v215_v31, %v67_v30  ;;  %v154_v56 = vmul.f32 %v218_v36, %v150_v39  ;;  %v224_v57 = vsel %vm112_vm12, 1.0, %v317_v21 }
  0x36   :  { %v155_v60 = vmul.f32 %v219_v42, %v151_v40  ;;  %v191_v61 = vadd.f32 %v223_v48, %v190_v52  ;;  %v144_v0 = vmul.f32 %v216_v34, %v68_v32  ;;  %v156_v1 = vmul.f32 %v220_v44, %v152_v43 }
  0x37   :  { %v185_v51 = vadd.f32 %v220_v44, %v184_v45  ;;  %v233_v53 = vpop.eup %232 }
  0x38   :  { %v235_v58 = vpop.eup %234  ;;  %v134_v59 = vmul.f32 0.6931472, %v233_v53  ;;  %v192_v6 = vadd.f32 %v224_v57, %v191_v61 }
  0x39   :  { %v237_v62 = vpop.eup %236  ;;  %v136_v63 = vmul.f32 0.6931472, %v235_v58  ;;  %187 = vst [vmem:[#allocation7 + $0x18] sm:$0xff] %v185_v51 }
  0x3a   :  { %v239_v2 = vpop.eup %238  ;;  %v138_v3 = vmul.f32 0.6931472, %v237_v62  ;;  %v145_v4 = vmul.f32 %v141_v49, %v134_v59  ;;  %v157_v5 = vmul.f32 %v153_v50, %v134_v59  ;;  %194 = vst [vmem:[#allocation7 + $0x20] sm:$0xff] %v192_v6 }
  0x3b   :  { %v140_v7 = vmul.f32 0.6931472, %v239_v2  ;;  %v146_v8 = vmul.f32 %v142_v54, %v136_v63  ;;  %v158_v9 = vmul.f32 %v154_v56, %v136_v63 }
  0x3c   :  { %v147_v10 = vmul.f32 %v143_v55, %v138_v3  ;;  %v159_v11 = vmul.f32 %v155_v60, %v138_v3 }
  0x3d   :  { %v148_v12 = vmul.f32 %v144_v0, %v140_v7  ;;  %v162_v13 = vadd.f32 %v146_v8, %v145_v4  ;;  %v160_v14 = vmul.f32 %v156_v1, %v140_v7  ;;  %v176_v15 = vadd.f32 %v158_v9, %v157_v5 }
  0x3f   :  { %v163_v16 = vadd.f32 %v162_v13, %v147_v10  ;;  %v177_v17 = vadd.f32 %v176_v15, %v159_v11 }
  0x41   :  { %v164_v18 = vadd.f32 %v163_v16, %v148_v12  ;;  %v178_v19 = vadd.f32 %v177_v17, %v160_v14 }
  0x43   :  { %166 = vst [vmem:[#allocation7] sm:$0xff] %v164_v18  ;;  %180 = vst [vmem:[#allocation7 + $0x10] sm:$0xff] %v178_v19 }
  0x44   :  { %295 = shalt.err (!%p292_p6)
}
  0x45   :  { %s296_s10 = scalar_lea.hbm %s448_s2, 640 }
  0x46   :  { %p297_p7 = scmp.ne.s32.totalorder %s448_s2, %s296_s10  ;;  %p300_p8 = scmp.lt.u32.totalorder %s296_s10, %s448_s2 }
  0x48   :  { %p302_p9 = pnand %p300_p8, %p297_p7 }
  0x4a   :  { %305 = shalt.err (!%p302_p9)
}
  0x4b   :  { %206 = dma.vmem_to_hbm [thread:$0]  %s201_s6, 640, %s448_s2, [#allocation4], %s313_s19, %s313_s19, %s314_s20  }
  0x4c   :  { %310 = dma.done.wait [#allocation4], 640  }
  0x4d   :  { %311 = vsyncadd [#allocation4], 4294966656 }
  0x4e   :  { %210 = vsyncpa [#allocation3], 1 }
  0x4f   :  { %211 = vsyncpa [#allocation6], 1 }
  0x50   :  { %212 = vsyncpa [#allocation4], 1 }

</bundles_post_ra>
